<compile_context>
chip_gen: v5e
topology: v5e:2x2
jax: 0.10.0
libtpu: 0.0.40
codegen_flags: <defaults>
</compile_context>

<pallas_src>
import functools

import jax
import jax.numpy as jnp
from jax.experimental import pallas as pl
from jax.experimental.pallas import tpu as pltpu


def _phnet_kernel(slab_ref, wtap_ref, w11_ref, o_ref, *, wp, tm, n_rows):
    """Fused CRPool -> square -> conv11(+bias) on one tile of TM pixel-lanes.

    slab_ref : (1, 9, TM + 2*(wp+1))  haloed, depth-unrolled, flattened input slab
    wtap_ref : (9, 13, 9)             per-spatial-tap stencil weights (row 12 == 0)
    w11_ref  : (3, 13)                conv11 weight with the bias as its last column
    o_ref    : (3, TM)                channels on sublanes, pixels on lanes
    """
    f32 = jnp.float32
    acc = jnp.zeros((n_rows, tm), f32)
    # 9 spatial taps = lane-offset views of the haloed slab (static offsets); each
    # contributes one small accumulating MXU matmul (default precision, f32 accumulate).
    for kh in range(3):
        for kw in range(3):
            off = kh * wp + kw
            tap = slab_ref[0, :, off:off + tm]                       # (9, TM)
            acc = acc + jnp.dot(wtap_ref[kh * 3 + kw], tap,
                                preferred_element_type=f32)          # (13, TM)
    # y*y, with the spare 13th row forced to 1 so the bias folds into the second
    # matmul (removes the (Cout,1) bias operand and its per-step broadcast).
    rows = jax.lax.broadcasted_iota(jnp.int32, acc.shape, 0)
    y2 = jnp.where(rows == n_rows - 1, 1.0, acc * acc)
    o_ref[...] = jnp.dot(w11_ref[...], y2,
                         preferred_element_type=f32).astype(o_ref.dtype)


def _pick_tile(mp):
    """Largest 128-multiple tile <= 4096 lanes that keeps >= 2 grid steps (v7x)."""
    lane, cap = 128, 4096
    tm = -(-mp // (2 * lane)) * lane          # ceil(mp/2), rounded up to a lane multiple
    return max(lane, min(cap, tm))


@jax.jit
def phnet_forward(x_ncdhw, params):
    """x_ncdhw: (N, 3, D=3, H, W) float32 in PyTorch NCDHW layout."""
    x = x_ncdhw.astype(jnp.float32)
    N, C, D, H, W = x.shape
    w_cr = params["w_cr"].astype(jnp.float32)      # (3, 3, 2, 3, 3)  CRPool, no bias
    w11 = params["w11"].astype(jnp.float32)        # (3, 3, 4, 1, 1)  conv11
    b11 = params["b11"].astype(jnp.float32)        # (3,)
    Cout, Cin = w_cr.shape[0], w_cr.shape[1]
    T = D + 1                                      # CRPool output depth (pad 1, k_d=2)
    assert w11.shape[2] == T, "conv11 depth kernel must collapse CRPool's output depth"
    CD = C * D                                     # 9 depth-unrolled input rows
    R = Cout * T + 1                               # 12 stencil outputs + ones row = 13
    Hp, Wp = H + 2, W + 2
    Mp = N * Hp * Wp                               # pixel-lane axis (padded centers)
    halo = Wp + 1                                  # one padded row + one column each side

    # ---- layout plumbing (only 9 rows/pixel; fused by XLA under jit) ----
    # (N,C,D,H,W) -> (C*D, N, Hp, Wp) -> flat pixel axis with a zero halo at both ends.
    x9 = jnp.transpose(x, (1, 2, 0, 3, 4)).reshape(CD, N, H, W)
    xp = jnp.pad(x9, ((0, 0), (0, 0), (1, 1), (1, 1)))
    flat = xp.reshape(CD, Mp)

    TM = _pick_tile(Mp)
    nT = pl.cdiv(Mp, TM)
    TMH = TM + 2 * halo
    Ltot = nT * TM + 2 * halo
    g = jnp.pad(flat, ((0, 0), (halo, Ltot - Mp - halo)))            # (CD, Ltot)
    # Per-tile haloed slabs (only 2*halo columns duplicated per tile), so every
    # BlockSpec block is a plain non-overlapping rectangle - no manual DMA needed.
    pos = jnp.arange(nT)[:, None] * TM + jnp.arange(TMH)[None, :]    # (nT, TMH)
    slabs = jnp.transpose(g[:, pos], (1, 0, 2))                      # (nT, CD, TMH)

    # ---- fold CRPool's depth taps into 9 per-spatial-tap weights (13, 9) ----
    # row = co*T + t (13th row all-zero), col = ci*D + d.
    wtap = jnp.zeros((9, R, CD), jnp.float32)
    for kh in range(3):
        for kw in range(3):
            for t in range(T):
                for d in range(D):
                    kd = d - t + 1                  # depth-kernel index, valid if 0 or 1
                    if 0 <= kd <= 1:
                        wtap = wtap.at[kh * 3 + kw, t:Cout * T:T, d:CD:D].set(
                            w_cr[:, :, kd, kh, kw])

    # conv11 as a (3, 13) matmul: columns ci*T + t, bias in the last column.
    w11aug = jnp.concatenate(
        [w11.reshape(Cout, Cin * T), b11.reshape(Cout, 1)], axis=1)

    kernel = functools.partial(_phnet_kernel, wp=Wp, tm=TM, n_rows=R)
    grid_spec = pltpu.PrefetchScalarGridSpec(
        num_scalar_prefetch=0,
        grid=(nT,),
        in_specs=[
            pl.BlockSpec((1, CD, TMH), lambda i: (i, 0, 0)),   # haloed pixel slab tile
            pl.BlockSpec((9, R, CD), lambda i: (0, 0, 0)),     # stencil weights, resident
            pl.BlockSpec((Cout, R), lambda i: (0, 0)),         # conv11 weight + bias col
        ],
        out_specs=pl.BlockSpec((Cout, TM), lambda i: (0, i)),  # lane-dense output tile
    )
    out2d = pl.pallas_call(
        kernel,
        out_shape=jax.ShapeDtypeStruct((Cout, nT * TM), jnp.float32),
        grid_spec=grid_spec,
        compiler_params=pltpu.CompilerParams(
            dimension_semantics=("parallel",),        # megacore-shard pixel tiles (v7x)
            vmem_limit_bytes=32 * 1024 * 1024,        # explicit; v5e default is 16 MiB
        ),
    )(slabs, wtap, w11aug)

    # Drop tail padding + border centers, back to (N, Cout, H, W) (squeeze(2) folded away).
    out = out2d[:, :Mp].reshape(Cout, N, Hp, Wp)[:, :, 1:H + 1, 1:W + 1]
    return jnp.transpose(out, (1, 0, 2, 3))


def ref_forward(x_ncdhw, params):
    """Pure-JAX reference of PHNet.forward (exact-precision ground truth)."""
    hi = jax.lax.Precision.HIGHEST
    x = x_ncdhw.astype(jnp.float32)
    dn = ("NCDHW", "OIDHW", "NCDHW")
    y = jax.lax.conv_general_dilated(
        x, params["w_cr"], window_strides=(1, 1, 1),
        padding=[(1, 1), (1, 1), (1, 1)], dimension_numbers=dn, precision=hi)
    y = y * y
    y = jax.lax.conv_general_dilated(
        y, params["w11"], window_strides=(1, 1, 1),
        padding=[(0, 0), (0, 0), (0, 0)], dimension_numbers=dn, precision=hi)
    y = y + params["b11"].reshape(1, -1, 1, 1, 1)
    return jnp.squeeze(y, axis=2)


if __name__ == "__main__":
    # PHNet: in_channels=3, frame=3 -> the input depth must equal 3 for squeeze(dim=2).
    N, C, D, H, W = 2, 3, 3, 16, 16
    key = jax.random.PRNGKey(0)
    k1, k2, k3, k4 = jax.random.split(key, 4)

    def bf16_exact(a):
        # Round test data to bf16-representable values so the correctness gate is
        # insensitive to whether the default-precision MXU path keeps f32 operands
        # exact or rounds them toward bf16 (see precision note in the header).
        return a.astype(jnp.bfloat16).astype(jnp.float32)

    params = {
        "w_cr": bf16_exact(0.2 * jax.random.normal(k1, (3, 3, 2, 3, 3), jnp.float32)),
        "w11":  bf16_exact(0.2 * jax.random.normal(k2, (3, 3, 4, 1, 1), jnp.float32)),
        "b11":  bf16_exact(0.1 * jax.random.normal(k3, (3,), jnp.float32)),
    }
    x = bf16_exact(jax.random.normal(k4, (N, C, D, H, W), jnp.float32))

    out = jax.block_until_ready(phnet_forward(x, params))
    ref = jax.block_until_ready(ref_forward(x, params))

    assert out.shape == (N, 3, H, W), out.shape
    err = jnp.abs(out - ref)
    max_err = float(jnp.max(err))
    mean_err = float(jnp.mean(err))
    # Structural-correctness gates: wiring/ordering bugs give O(1) errors.  With exact
    # f32 matmuls the measured max error is ~1e-6; even a bf16-demoting default
    # precision path stays well inside these bounds on bf16-exact inputs.
    assert max_err < 5e-2, f"max abs error {max_err}"
    assert mean_err < 5e-3, f"mean abs error {mean_err}"
    print("KERNEL_OK")
</pallas_src>

<mosaic_0001>
module attributes {stable_mosaic.version = 11 : i64} {
  func.func @_phnet_kernel(%arg0: i32, %arg1: memref<1x9x422xf32, #tpu.memory_space<vmem>>, %arg2: memref<9x13x9xf32, #tpu.memory_space<vmem>>, %arg3: memref<3x13xf32, #tpu.memory_space<vmem>>, %arg4: memref<3x384xf32, #tpu.memory_space<vmem>>) attributes {dimension_semantics = [#tpu.dimension_semantics<parallel>], iteration_bounds = array<i64: 2>, scalar_prefetch = 0 : i64, scratch_operands = 0 : i64, tpu.core_type = #tpu.core_type<tc>, window_params = [{transform_indices = @transform_0, window_bounds = array<i64: 1, 9, 422>}, {pipeline_mode = #tpu.pipeline_mode<synchronous>, transform_indices = @transform_1, window_bounds = array<i64: 9, 13, 9>}, {pipeline_mode = #tpu.pipeline_mode<synchronous>, transform_indices = @transform_2, window_bounds = array<i64: 3, 13>}, {transform_indices = @transform_3, window_bounds = array<i64: 3, 384>}]} {
    %cst = arith.constant 0.000000e+00 : f32
    %0 = vector.broadcast %cst : f32 to vector<13x384xf32>
    %c0 = arith.constant 0 : index
    %c0_0 = arith.constant 0 : index
    %c0_1 = arith.constant 0 : index
    %1 = vector.load %arg1[%c0, %c0_0, %c0_1] : memref<1x9x422xf32, #tpu.memory_space<vmem>>, vector<1x9x384xf32>
    %2 = vector.shape_cast %1 : vector<1x9x384xf32> to vector<9x384xf32>
    %c0_2 = arith.constant 0 : index
    %c0_3 = arith.constant 0 : index
    %c0_4 = arith.constant 0 : index
    %3 = vector.load %arg2[%c0_2, %c0_3, %c0_4] : memref<9x13x9xf32, #tpu.memory_space<vmem>>, vector<1x13x9xf32>
    %4 = vector.shape_cast %3 : vector<1x13x9xf32> to vector<13x9xf32>
    %cst_5 = arith.constant dense<0.000000e+00> : vector<13x384xf32>
    %5 = tpu.matmul %4, %2, %cst_5 {dimension_numbers = #tpu.dot_dimension_numbers<[1], [0], [0], [1], [0, 0, 1, 1], [], []>} : vector<13x9xf32>, vector<9x384xf32>, vector<13x384xf32> -> vector<13x384xf32>
    %6 = arith.addf %0, %5 : vector<13x384xf32>
    %c0_6 = arith.constant 0 : index
    %c0_7 = arith.constant 0 : index
    %c1 = arith.constant 1 : index
    %7 = vector.load %arg1[%c0_6, %c0_7, %c1] : memref<1x9x422xf32, #tpu.memory_space<vmem>>, vector<1x9x384xf32>
    %8 = vector.shape_cast %7 : vector<1x9x384xf32> to vector<9x384xf32>
    %c1_8 = arith.constant 1 : index
    %c0_9 = arith.constant 0 : index
    %c0_10 = arith.constant 0 : index
    %9 = vector.load %arg2[%c1_8, %c0_9, %c0_10] : memref<9x13x9xf32, #tpu.memory_space<vmem>>, vector<1x13x9xf32>
    %10 = vector.shape_cast %9 : vector<1x13x9xf32> to vector<13x9xf32>
    %cst_11 = arith.constant dense<0.000000e+00> : vector<13x384xf32>
    %11 = tpu.matmul %10, %8, %cst_11 {dimension_numbers = #tpu.dot_dimension_numbers<[1], [0], [0], [1], [0, 0, 1, 1], [], []>} : vector<13x9xf32>, vector<9x384xf32>, vector<13x384xf32> -> vector<13x384xf32>
    %12 = arith.addf %6, %11 : vector<13x384xf32>
    %c0_12 = arith.constant 0 : index
    %c0_13 = arith.constant 0 : index
    %c2 = arith.constant 2 : index
    %13 = vector.load %arg1[%c0_12, %c0_13, %c2] : memref<1x9x422xf32, #tpu.memory_space<vmem>>, vector<1x9x384xf32>
    %14 = vector.shape_cast %13 : vector<1x9x384xf32> to vector<9x384xf32>
    %c2_14 = arith.constant 2 : index
    %c0_15 = arith.constant 0 : index
    %c0_16 = arith.constant 0 : index
    %15 = vector.load %arg2[%c2_14, %c0_15, %c0_16] : memref<9x13x9xf32, #tpu.memory_space<vmem>>, vector<1x13x9xf32>
    %16 = vector.shape_cast %15 : vector<1x13x9xf32> to vector<13x9xf32>
    %cst_17 = arith.constant dense<0.000000e+00> : vector<13x384xf32>
    %17 = tpu.matmul %16, %14, %cst_17 {dimension_numbers = #tpu.dot_dimension_numbers<[1], [0], [0], [1], [0, 0, 1, 1], [], []>} : vector<13x9xf32>, vector<9x384xf32>, vector<13x384xf32> -> vector<13x384xf32>
    %18 = arith.addf %12, %17 : vector<13x384xf32>
    %c0_18 = arith.constant 0 : index
    %c0_19 = arith.constant 0 : index
    %c18 = arith.constant 18 : index
    %19 = vector.load %arg1[%c0_18, %c0_19, %c18] : memref<1x9x422xf32, #tpu.memory_space<vmem>>, vector<1x9x384xf32>
    %20 = vector.shape_cast %19 : vector<1x9x384xf32> to vector<9x384xf32>
    %c3 = arith.constant 3 : index
    %c0_20 = arith.constant 0 : index
    %c0_21 = arith.constant 0 : index
    %21 = vector.load %arg2[%c3, %c0_20, %c0_21] : memref<9x13x9xf32, #tpu.memory_space<vmem>>, vector<1x13x9xf32>
    %22 = vector.shape_cast %21 : vector<1x13x9xf32> to vector<13x9xf32>
    %cst_22 = arith.constant dense<0.000000e+00> : vector<13x384xf32>
    %23 = tpu.matmul %22, %20, %cst_22 {dimension_numbers = #tpu.dot_dimension_numbers<[1], [0], [0], [1], [0, 0, 1, 1], [], []>} : vector<13x9xf32>, vector<9x384xf32>, vector<13x384xf32> -> vector<13x384xf32>
    %24 = arith.addf %18, %23 : vector<13x384xf32>
    %c0_23 = arith.constant 0 : index
    %c0_24 = arith.constant 0 : index
    %c19 = arith.constant 19 : index
    %25 = vector.load %arg1[%c0_23, %c0_24, %c19] : memref<1x9x422xf32, #tpu.memory_space<vmem>>, vector<1x9x384xf32>
    %26 = vector.shape_cast %25 : vector<1x9x384xf32> to vector<9x384xf32>
    %c4 = arith.constant 4 : index
    %c0_25 = arith.constant 0 : index
    %c0_26 = arith.constant 0 : index
    %27 = vector.load %arg2[%c4, %c0_25, %c0_26] : memref<9x13x9xf32, #tpu.memory_space<vmem>>, vector<1x13x9xf32>
    %28 = vector.shape_cast %27 : vector<1x13x9xf32> to vector<13x9xf32>
    %cst_27 = arith.constant dense<0.000000e+00> : vector<13x384xf32>
    %29 = tpu.matmul %28, %26, %cst_27 {dimension_numbers = #tpu.dot_dimension_numbers<[1], [0], [0], [1], [0, 0, 1, 1], [], []>} : vector<13x9xf32>, vector<9x384xf32>, vector<13x384xf32> -> vector<13x384xf32>
    %30 = arith.addf %24, %29 : vector<13x384xf32>
    %c0_28 = arith.constant 0 : index
    %c0_29 = arith.constant 0 : index
    %c20 = arith.constant 20 : index
    %31 = vector.load %arg1[%c0_28, %c0_29, %c20] : memref<1x9x422xf32, #tpu.memory_space<vmem>>, vector<1x9x384xf32>
    %32 = vector.shape_cast %31 : vector<1x9x384xf32> to vector<9x384xf32>
    %c5 = arith.constant 5 : index
    %c0_30 = arith.constant 0 : index
    %c0_31 = arith.constant 0 : index
    %33 = vector.load %arg2[%c5, %c0_30, %c0_31] : memref<9x13x9xf32, #tpu.memory_space<vmem>>, vector<1x13x9xf32>
    %34 = vector.shape_cast %33 : vector<1x13x9xf32> to vector<13x9xf32>
    %cst_32 = arith.constant dense<0.000000e+00> : vector<13x384xf32>
    %35 = tpu.matmul %34, %32, %cst_32 {dimension_numbers = #tpu.dot_dimension_numbers<[1], [0], [0], [1], [0, 0, 1, 1], [], []>} : vector<13x9xf32>, vector<9x384xf32>, vector<13x384xf32> -> vector<13x384xf32>
    %36 = arith.addf %30, %35 : vector<13x384xf32>
    %c0_33 = arith.constant 0 : index
    %c0_34 = arith.constant 0 : index
    %c36 = arith.constant 36 : index
    %37 = vector.load %arg1[%c0_33, %c0_34, %c36] : memref<1x9x422xf32, #tpu.memory_space<vmem>>, vector<1x9x384xf32>
    %38 = vector.shape_cast %37 : vector<1x9x384xf32> to vector<9x384xf32>
    %c6 = arith.constant 6 : index
    %c0_35 = arith.constant 0 : index
    %c0_36 = arith.constant 0 : index
    %39 = vector.load %arg2[%c6, %c0_35, %c0_36] : memref<9x13x9xf32, #tpu.memory_space<vmem>>, vector<1x13x9xf32>
    %40 = vector.shape_cast %39 : vector<1x13x9xf32> to vector<13x9xf32>
    %cst_37 = arith.constant dense<0.000000e+00> : vector<13x384xf32>
    %41 = tpu.matmul %40, %38, %cst_37 {dimension_numbers = #tpu.dot_dimension_numbers<[1], [0], [0], [1], [0, 0, 1, 1], [], []>} : vector<13x9xf32>, vector<9x384xf32>, vector<13x384xf32> -> vector<13x384xf32>
    %42 = arith.addf %36, %41 : vector<13x384xf32>
    %c0_38 = arith.constant 0 : index
    %c0_39 = arith.constant 0 : index
    %c37 = arith.constant 37 : index
    %43 = vector.load %arg1[%c0_38, %c0_39, %c37] : memref<1x9x422xf32, #tpu.memory_space<vmem>>, vector<1x9x384xf32>
    %44 = vector.shape_cast %43 : vector<1x9x384xf32> to vector<9x384xf32>
    %c7 = arith.constant 7 : index
    %c0_40 = arith.constant 0 : index
    %c0_41 = arith.constant 0 : index
    %45 = vector.load %arg2[%c7, %c0_40, %c0_41] : memref<9x13x9xf32, #tpu.memory_space<vmem>>, vector<1x13x9xf32>
    %46 = vector.shape_cast %45 : vector<1x13x9xf32> to vector<13x9xf32>
    %cst_42 = arith.constant dense<0.000000e+00> : vector<13x384xf32>
    %47 = tpu.matmul %46, %44, %cst_42 {dimension_numbers = #tpu.dot_dimension_numbers<[1], [0], [0], [1], [0, 0, 1, 1], [], []>} : vector<13x9xf32>, vector<9x384xf32>, vector<13x384xf32> -> vector<13x384xf32>
    %48 = arith.addf %42, %47 : vector<13x384xf32>
    %c0_43 = arith.constant 0 : index
    %c0_44 = arith.constant 0 : index
    %c38 = arith.constant 38 : index
    %49 = vector.load %arg1[%c0_43, %c0_44, %c38] : memref<1x9x422xf32, #tpu.memory_space<vmem>>, vector<1x9x384xf32>
    %50 = vector.shape_cast %49 : vector<1x9x384xf32> to vector<9x384xf32>
    %c8 = arith.constant 8 : index
    %c0_45 = arith.constant 0 : index
    %c0_46 = arith.constant 0 : index
    %51 = vector.load %arg2[%c8, %c0_45, %c0_46] : memref<9x13x9xf32, #tpu.memory_space<vmem>>, vector<1x13x9xf32>
    %52 = vector.shape_cast %51 : vector<1x13x9xf32> to vector<13x9xf32>
    %cst_47 = arith.constant dense<0.000000e+00> : vector<13x384xf32>
    %53 = tpu.matmul %52, %50, %cst_47 {dimension_numbers = #tpu.dot_dimension_numbers<[1], [0], [0], [1], [0, 0, 1, 1], [], []>} : vector<13x9xf32>, vector<9x384xf32>, vector<13x384xf32> -> vector<13x384xf32>
    %54 = arith.addf %48, %53 : vector<13x384xf32>
    %55 = tpu.iota {dimensions = array<i32: 0>} : vector<13x384xi32>
    %c12_i32 = arith.constant 12 : i32
    %56 = vector.broadcast %c12_i32 : i32 to vector<13x384xi32>
    %57 = arith.cmpi eq, %55, %56 : vector<13x384xi32>
    %58 = arith.mulf %54, %54 : vector<13x384xf32>
    %cst_48 = arith.constant 1.000000e+00 : f32
    %59 = vector.broadcast %cst_48 : f32 to vector<13x384xf32>
    %60 = arith.select %57, %59, %58 : vector<13x384xi1>, vector<13x384xf32>
    %c0_49 = arith.constant 0 : index
    %c0_50 = arith.constant 0 : index
    %61 = vector.load %arg3[%c0_49, %c0_50] : memref<3x13xf32, #tpu.memory_space<vmem>>, vector<3x13xf32>
    %cst_51 = arith.constant dense<0.000000e+00> : vector<3x384xf32>
    %62 = tpu.matmul %61, %60, %cst_51 {dimension_numbers = #tpu.dot_dimension_numbers<[1], [0], [0], [1], [0, 0, 1, 1], [], []>} : vector<3x13xf32>, vector<13x384xf32>, vector<3x384xf32> -> vector<3x384xf32>
    %c0_52 = arith.constant 0 : index
    %c0_53 = arith.constant 0 : index
    %63 = vector.load %arg4[%c0_52, %c0_53] : memref<3x384xf32, #tpu.memory_space<vmem>>, vector<3x384xf32>
    tpu.vector_store %arg4[%c0_52, %c0_53], %62 {strides = array<i32>} : memref<3x384xf32, #tpu.memory_space<vmem>>, vector<3x384xf32>,
    return
  }
  func.func @transform_0(%arg0: i32) -> (i32, i32, i32) {
    %c0_i32 = arith.constant 0 : i32
    %c0_i32_0 = arith.constant 0 : i32
    %c0_i32_1 = arith.constant 0 : i32
    return %arg0, %c0_i32, %c0_i32_0 : i32, i32, i32
  }
  func.func @transform_1(%arg0: i32) -> (i32, i32, i32) {
    %c0_i32 = arith.constant 0 : i32
    %c0_i32_0 = arith.constant 0 : i32
    %c0_i32_1 = arith.constant 0 : i32
    %c0_i32_2 = arith.constant 0 : i32
    return %c0_i32, %c0_i32_0, %c0_i32_1 : i32, i32, i32
  }
  func.func @transform_2(%arg0: i32) -> (i32, i32) {
    %c0_i32 = arith.constant 0 : i32
    %c0_i32_0 = arith.constant 0 : i32
    %c0_i32_1 = arith.constant 0 : i32
    return %c0_i32, %c0_i32_0 : i32, i32
  }
  func.func @transform_3(%arg0: i32) -> (i32, i32) {
    %c0_i32 = arith.constant 0 : i32
    %c0_i32_0 = arith.constant 0 : i32
    return %c0_i32, %arg0 : i32, i32
  }
}

</mosaic_0001>

<bundles_post_ra>
// kernel: phnet_forward.1
= control target key start
LH: loop header
LB: loop body
LE: loop exit
PB: predicated region body
PF: predicated region fallthrough
CT: control target
= control target key end

     0   :  { %s1587_s12 = smov 0   ;;  %s1925_s0 = inlined_call_operand.vmem [shape: f32[2,9,422], index: 0, kind: input, shape index: {}]   ;;  %s1926_s1 = inlined_call_operand.vmem [shape: f32[9,13,9], index: 1, kind: input, shape index: {}]   ;;  %s1927_s2 = inlined_call_operand.vmem [shape: f32[3,13], index: 2, kind: input, shape index: {}]   ;;  %s1928_s3 = inlined_call_operand.vmem [shape: f32[3,768], index: 3, kind: output, shape index: {}]  }
   0x1 LB: > { %s1593_s13 = sadd.s32 4294967295, %s1557_s12   ;;  %p1355_p0 = scmp.ge.s32.totalorder %s1557_s12, 1  ;;  %s1557_s12 = sphi %s1587_s12, %s13_s12  }
   0x2   : > { %p137_p1 = scmp.lt.s32.totalorder %s1557_s12, 3 }
   0x4   : > { %p138_p2 = pnand %p1355_p0, %p137_p1 }
   0x5   : > { %p161_p3 = scmp.lt.s32.totalorder (!%p138_p2), %s1593_s13, 1  ;;  %s1559_s19 = smov (!%p138_p2), 127  }
   0x6   : > { %141 = sbr.rel (%p138_p2) target bundleno = 539 (0x21b), region = 32  ;;  %s1560_s20 = smov (!%p138_p2), 126  }
   0x7   : > { %s1561_s21 = smov (!%p138_p2), 110   ;;  %s1562_s22 = smov (!%p138_p2), 109  }
   0x8   : > { %s1563_s23 = smov (!%p138_p2), 108   ;;  %s1564_s24 = smov (!%p138_p2), 92  }
   0x9   : > { %s1565_s25 = smov (!%p138_p2), 91   ;;  %s1566_s30 = smov (!%p138_p2), 90  }
   0xb   : > { %s162_s14 = scalar_select %p161_p3, %s1593_s13, 1  ;;  %vm226_vm0 = vcmask 1040384   ;;  %vm219_vm1 = vcmask 72704   ;;  %v1659_v13 = vld [vmem:[%s1926_s1] sm:$0xff]  ;;  %v1669_v15 = vld [vmem:[%s1926_s1 + $0x8] sm:$0x1f] }
   0xc   : > { %vm209_vm2 = vcmask 1039360   ;;  %v1359_v27 = vld [vmem:[%s1926_s1 + $0x10] sm:$0xff]  ;;  %vm402_vm3 = vcmask 1031168   ;;  %v1360_v38 = vld [vmem:[%s1926_s1 + $0x18] sm:$0x1f]  ;;  %v1379_v48 = vld [vmem:[%s1926_s1 + $0x20] sm:$0xff] }
   0xd   : > { %s1464_s15 = sshll.u32 %s162_s14, 6  ;;  %vm518_vm4 = vcmask 900096   ;;  %v1380_v56 = vld [vmem:[%s1926_s1 + $0x28] sm:$0x1f]  ;;  %vm634_vm5 = vcmask 891904   ;;  %vm750_vm6 = vcmask 883712  }
   0xe   : > { %s165_s18 = scalar_lea.vmem %s1925_s0, %s1464_s15  ;;  %vm866_vm7 = vcmask 752640   ;;  %vm982_vm8 = vcmask 744448   ;;  %vm1098_vm9 = vcmask 736256   ;;  %vm1217_vm11 = vcmask 1044480   ;;  %s166_s15 = smul.u32 3, %s1593_s13 }
   0xf   : > { %v1602_v0 = vld [vmem:[%s165_s18 + $0x20] sm:$0x1]  ;;  %v1604_v2 = vld [vmem:[%s165_s18 + $0x8] sm:$0xff]  ;;  %v1610_v4 = vld [vmem:[%s165_s18 + $0x10] sm:$0xff]  ;;  %vm1213_vm12 = vcmask 105472   ;;  %vm1290_vm13 = vcmask 1043456  }
  0x10   : > { %v172_v1 = vld [vmem:[%s165_s18] sm:$0xff]  ;;  %201 = vrot.lane.b32.xlu0 %v1602_v0, %s1559_s19  ;;  %v1612_v5 = vld [vmem:[%s165_s18 + $0x18] sm:$0xff]  ;;  %v1617_v7 = vld [vmem:[%s165_s18 + $0x28] sm:$0x1]  ;;  %v1521_v10 = vpack.i.bf16 %v1610_v4, %v1604_v2  ;;  %1370 = vmatpush.msk.msra.mxu3 %vm226_vm0, %v1602_v0  ;;  %p167_p4 = scmp.lt.s32.totalorder %s166_s15, 5 }
  0x11   : > { %v1608_v3 = vpack.i.bf16 %v1604_v2, %v172_v1  ;;  %v1486_v6 = vpack.i.bf16 %v1612_v5, %v1610_v4  ;;  %v1619_v8 = vld [vmem:[%s165_s18 + $0x30] sm:$0x1]  ;;  %v1622_v9 = vld [vmem:[%s165_s18 + $0x38] sm:$0x1]  ;;  %v1526_v11 = vpack.i.bf16 %v172_v1, %v1612_v5 }
  0x12   : > { %329 = vmatpush.msra.mxu3 %v172_v1  ;;  %v1390_v1 = vld [vmem:[%s1926_s1 + $0x30] sm:$0xff]  ;;  %s1930_s15 = smov (!%p167_p4, %s166_s15), 5 }
  0x13   : > { %1482 = vrot.lane.b32.xlu1 %v1608_v3, %s1559_s19  ;;  %1487 = vrot.lane.b32.xlu2 %v1486_v6, %s1559_s19  ;;  %s1358_s16 = sshll.u32 %s1930_s15, 2 }
  0x14   : > { %1371 = vmatmul.msk.f32.vlgmr.msra.gmra.mxu3 %vm219_vm1, %v1659_v13 }
  0x18   : > { %203 = vrot.lane.b32.xlu0 %v1617_v7, %s1559_s19 }
  0x1b   : > { %205 = vrot.lane.b32.xlu1 %v1619_v8, %s1559_s19  ;;  %207 = vrot.lane.b32.xlu2 %v1622_v9, %s1559_s19  ;;  %s170_s19 = scalar_lea.vmem %s1928_s3, %s1358_s16 }
  0x1c   : > { %1372 = vmatmul.msk.f32.gmra.mxu3 %vm219_vm1, %v1669_v15 }
  0x20   : > { %394 = vrot.lane.b32.xlu0 %v1602_v0, %s1560_s20 }
  0x23   : > { %396 = vrot.lane.b32.xlu1 %v1617_v7, %s1560_s20  ;;  %1492 = vrot.lane.b32.xlu2 %v1608_v3, %s1560_s20 }
  0x28   : > { %398 = vrot.lane.b32.xlu0 %v1619_v8, %s1560_s20 }
  0x2b   : > { %400 = vrot.lane.b32.xlu1 %v1622_v9, %s1560_s20  ;;  %1497 = vrot.lane.b32.xlu2 %v1486_v6, %s1560_s20 }
  0x30   : > { %510 = vrot.lane.b32.xlu0 %v1602_v0, %s1561_s21 }
  0x33   : > { %512 = vrot.lane.b32.xlu1 %v1617_v7, %s1561_s21  ;;  %1502 = vrot.lane.b32.xlu2 %v1608_v3, %s1561_s21 }
  0x38   : > { %514 = vrot.lane.b32.xlu0 %v1619_v8, %s1561_s21 }
  0x3b   : > { %1507 = vrot.lane.b32.xlu1 %v1486_v6, %s1561_s21  ;;  %626 = vrot.lane.b32.xlu2 %v1602_v0, %s1562_s22 }
  0x40   : > { %628 = vrot.lane.b32.xlu0 %v1617_v7, %s1562_s22 }
  0x43   : > { %1512 = vrot.lane.b32.xlu1 %v1608_v3, %s1562_s22  ;;  %630 = vrot.lane.b32.xlu2 %v1619_v8, %s1562_s22 }
  0x48   : > { %516 = vrot.lane.b32.xlu0 %v1622_v9, %s1561_s21 }
  0x4b   : > { %1517 = vrot.lane.b32.xlu1 %v1486_v6, %s1562_s22  ;;  %632 = vrot.lane.b32.xlu2 %v1622_v9, %s1562_s22 }
  0x50   : > { %744 = vrot.lane.b32.xlu0 %v1617_v7, %s1563_s23 }
  0x53   : > { %746 = vrot.lane.b32.xlu1 %v1619_v8, %s1563_s23  ;;  %1522 = vrot.lane.b32.xlu2 %v1521_v10, %s1563_s23  ;;  %v1391_v10 = vld [vmem:[%s1926_s1 + $0x38] sm:$0x1f] }
  0x58   : > { %748 = vrot.lane.b32.xlu0 %v1622_v9, %s1563_s23 }
  0x5b   : > { %742 = vrot.lane.b32.xlu1 %v1602_v0, %s1563_s23  ;;  %1527 = vrot.lane.b32.xlu2 %v1526_v11, %s1563_s23 }
  0x60   : > { %858 = vrot.lane.b32.xlu0 %v1602_v0, %s1564_s24 }
  0x63   : > { %860 = vrot.lane.b32.xlu1 %v1617_v7, %s1564_s24  ;;  %1532 = vrot.lane.b32.xlu2 %v1608_v3, %s1564_s24 }
  0x68   : > { %862 = vrot.lane.b32.xlu0 %v1619_v8, %s1564_s24 }
  0x6b   : > { %864 = vrot.lane.b32.xlu1 %v1622_v9, %s1564_s24  ;;  %1537 = vrot.lane.b32.xlu2 %v1486_v6, %s1564_s24 }
  0x6d   : > { %v1488_v12 = vpop.permute.xlu2 %1487 }
  0x6e   : > { %v1489_v23 = vunpack.i.l.bf16 %v1488_v12  ;;  %v1490_v25 = vunpack.i.h.bf16 %v1488_v12 }
  0x70   : > { %974 = vrot.lane.b32.xlu0 %v1602_v0, %s1565_s25  ;;  %v212_v33 = vsel %vm209_vm2, %v1489_v23, %v1490_v25 }
  0x73   : > { %976 = vrot.lane.b32.xlu1 %v1617_v7, %s1565_s25  ;;  %1542 = vrot.lane.b32.xlu2 %v1608_v3, %s1565_s25 }
  0x75   : > { %v208_v14 = vpop.permute.xlu2 %207 }
  0x78   : > { %978 = vrot.lane.b32.xlu0 %v1619_v8, %s1565_s25 }
  0x7b   : > { %970 = vrot.lane.b32.xlu1 %v1610_v4, %s1565_s25  ;;  %1090 = vrot.lane.b32.xlu2 %v1602_v0, %s1566_s30 }
  0x7d   : > { %v1493_v16 = vpop.permute.xlu2 %1492 }
  0x7e   : > { %v1495_v34 = vunpack.i.h.bf16 %v1493_v16  ;;  %v1494_v35 = vunpack.i.l.bf16 %v1493_v16  ;;  %v1401_v16 = vld [vmem:[%s1926_s1 + $0x40] sm:$0xff] }
  0x80   : > { %1092 = vrot.lane.b32.xlu0 %v1617_v7, %s1566_s30  ;;  %v403_v40 = vsel %vm402_vm3, %v1494_v35, %v1495_v34 }
  0x82   : > { %v202_v17 = vpop.permute.xlu0 %201 }
  0x83   : > { %1547 = vrot.lane.b32.xlu1 %v1608_v3, %s1566_s30  ;;  %1094 = vrot.lane.b32.xlu2 %v1619_v8, %s1566_s30 }
  0x85   : > { %v1483_v18 = vpop.permute.xlu1 %1482  ;;  %v1498_v19 = vpop.permute.xlu2 %1497 }
  0x86   : > { %v1485_v20 = vunpack.i.h.bf16 %v1483_v18  ;;  %v1484_v21 = vunpack.i.l.bf16 %v1483_v18  ;;  %v1499_v42 = vunpack.i.l.bf16 %v1498_v19  ;;  %v1500_v43 = vunpack.i.h.bf16 %v1498_v19 }
  0x88   : > { %980 = vrot.lane.b32.xlu0 %v1622_v9, %s1565_s25  ;;  %v210_v28 = vsel %vm209_vm2, %v1484_v21, %v1485_v20  ;;  %v211_v32 = vsel %vm209_vm2, %v1485_v20, %v1489_v23  ;;  %v404_v46 = vsel %vm402_vm3, %v1495_v34, %v1499_v42  ;;  %v405_v50 = vsel %vm402_vm3, %v1499_v42, %v1500_v43 }
  0x8a   : > { %v204_v22 = vpop.permute.xlu0 %203 }
  0x8b   : > { %1086 = vrot.lane.b32.xlu1 %v1610_v4, %s1566_s30  ;;  %v213_v24 = vsel %vm209_vm2, %v202_v17, %v204_v22  ;;  %972 = vrot.lane.b32.xlu2 %v1612_v5, %s1565_s25 }
  0x8c   : > { %1361 = vmatpush.msk.msra.mxu0 %vm226_vm0, %v213_v24 }
  0x8d   : > { %v206_v26 = vpop.permute.xlu1 %205  ;;  %v1694_v31 = vpop.permute.xlu2 %1502 }
  0x8e   : > { %v214_v29 = vsel %vm209_vm2, %v204_v22, %v206_v26  ;;  %v215_v30 = vsel %vm209_vm2, %v206_v26, %v208_v14  ;;  %248 = vmatpush.msra.mxu0 %v210_v28  ;;  %v1505_v52 = vunpack.i.h.bf16 %v1694_v31  ;;  %v1504_v53 = vunpack.i.l.bf16 %v1694_v31 }
  0x8f   : > { %1364 = vmatpush.msk.msra.mxu1 %vm226_vm0, %v214_v29  ;;  %1367 = vmatpush.msk.msra.mxu2 %vm226_vm0, %v215_v30 }
  0x90   : > { %1362 = vmatmul.msk.f32.vlgmr.msra.gmra.mxu0 %vm219_vm1, %v1359_v27  ;;  %1096 = vrot.lane.b32.xlu0 %v1622_v9, %s1566_s30  ;;  %v519_v58 = vsel %vm518_vm4, %v1504_v53, %v1505_v52 }
  0x91   : > { %271 = vmatpush.msra.mxu1 %v211_v32  ;;  %294 = vmatpush.msra.mxu2 %v212_v33 }
  0x92   : > { %1365 = vmatmul.msk.f32.vlgmr.msra.gmra.mxu1 %vm219_vm1, %v1359_v27  ;;  %1368 = vmatmul.msk.f32.vlgmr.msra.gmra.mxu2 %vm219_vm1, %v1359_v27  ;;  %v395_v36 = vpop.permute.xlu0 %394  ;;  %v1402_v27 = vld [vmem:[%s1926_s1 + $0x48] sm:$0x1f] }
  0x93   : > { %1088 = vrot.lane.b32.xlu1 %v1612_v5, %s1566_s30  ;;  %1373 = vmatpush.msk.msrb.mxu0 %vm226_vm0, %v1617_v7 }
  0x94   : > { %1376 = vmatpush.msk.msrb.mxu1 %vm226_vm0, %v1619_v8 }
  0x95   : > { %v397_v37 = vpop.permute.xlu1 %396  ;;  %352 = vmatpush.msrb.mxu0 %v1604_v2  ;;  %v627_v41 = vpop.permute.xlu2 %626 }
  0x96   : > { %v406_v39 = vsel %vm402_vm3, %v395_v36, %v397_v37  ;;  %375 = vmatpush.msrb.mxu1 %v1610_v4 }
  0x97   : > { %1381 = vmatpush.msk.msrb.mxu2 %vm226_vm0, %v406_v39 }
  0x98   : > { %1363 = vmatmul.msk.f32.gmra.mxu0 %vm219_vm1, %v1360_v38 }
  0x99   : > { %439 = vmatpush.msrb.mxu2 %v403_v40 }
  0x9a   : > { %1366 = vmatmul.msk.f32.gmra.mxu1 %vm219_vm1, %v1360_v38  ;;  %1369 = vmatmul.msk.f32.gmra.mxu2 %vm219_vm1, %v1360_v38  ;;  %v399_v44 = vpop.permute.xlu0 %398 }
  0x9b   : > { %v407_v45 = vsel %vm402_vm3, %v397_v37, %v399_v44  ;;  %v1412_v37 = vld [vmem:[%s1926_s1 + $0x50] sm:$0xff] }
  0x9c   : > { %1384 = vmatpush.msk.msrb.mxu3 %vm226_vm0, %v407_v45  ;;  %v1413_v45 = vld [vmem:[%s1926_s1 + $0x58] sm:$0x1f] }
  0x9d   : > { %v401_v47 = vpop.permute.xlu1 %400  ;;  %v631_v51 = vpop.permute.xlu2 %630 }
  0x9e   : > { %v408_v49 = vsel %vm402_vm3, %v399_v44, %v401_v47  ;;  %462 = vmatpush.msrb.mxu3 %v404_v46 }
  0x9f   : > { %1387 = vmatpush.msk.msra.mxu0 %vm226_vm0, %v408_v49  ;;  %1385 = vmatmul.msk.f32.vlgmr.msrb.gmra.mxu3 %vm219_vm1, %v1379_v48  ;;  %v1423_v49 = vld [vmem:[%s1926_s1 + $0x60] sm:$0xff] }
  0xa0   : > { %1374 = vmatmul.msk.f32.vlgmr.msrb.gmra.mxu0 %vm219_vm1, %v1659_v13 }
  0xa1   : > { %485 = vmatpush.msra.mxu0 %v405_v50 }
  0xa2   : > { %1377 = vmatmul.msk.f32.vlgmr.msrb.gmra.mxu1 %vm219_vm1, %v1659_v13  ;;  %1382 = vmatmul.msk.f32.vlgmr.msrb.gmra.mxu2 %vm219_vm1, %v1379_v48  ;;  %v511_v54 = vpop.permute.xlu0 %510 }
  0xa5   : > { %v513_v55 = vpop.permute.xlu1 %512  ;;  %v633_v60 = vpop.permute.xlu2 %632 }
  0xa6   : > { %v522_v57 = vsel %vm518_vm4, %v511_v54, %v513_v55  ;;  %v640_v0 = vsel %vm634_vm5, %v631_v51, %v633_v60 }
  0xa7   : > { %1392 = vmatpush.msk.msra.mxu1 %vm226_vm0, %v522_v57  ;;  %1386 = vmatmul.msk.f32.gmra.mxu3 %vm219_vm1, %v1380_v56 }
  0xa8   : > { %1375 = vmatmul.msk.f32.gmra.mxu0 %vm219_vm1, %v1669_v15 }
  0xa9   : > { %555 = vmatpush.msra.mxu1 %v519_v58  ;;  %v1424_v58 = vld [vmem:[%s1926_s1 + $0x68] sm:$0x1f] }
  0xaa   : > { %1378 = vmatmul.msk.f32.gmra.mxu1 %vm219_vm1, %v1669_v15  ;;  %1383 = vmatmul.msk.f32.gmra.mxu2 %vm219_vm1, %v1380_v56  ;;  %v515_v59 = vpop.permute.xlu0 %514 }
  0xab   : > { %v523_v61 = vsel %vm518_vm4, %v513_v55, %v515_v59 }
  0xac   : > { %1395 = vmatpush.msk.msra.mxu2 %vm226_vm0, %v523_v61 }
  0xad   : > { %v1508_v62 = vpop.permute.xlu1 %1507  ;;  %v1523_v6 = vpop.permute.xlu2 %1522 }
  0xae   : > { %v1509_v63 = vunpack.i.l.bf16 %v1508_v62  ;;  %v1510_v12 = vunpack.i.h.bf16 %v1508_v62  ;;  %v1525_v23 = vunpack.i.h.bf16 %v1523_v6  ;;  %v1524_v24 = vunpack.i.l.bf16 %v1523_v6 }
  0xb0   : > { %1388 = vmatmul.msk.f32.vlgmr.msra.gmra.mxu0 %vm219_vm1, %v1379_v48  ;;  %v520_v2 = vsel %vm518_vm4, %v1505_v52, %v1509_v63  ;;  %v521_v19 = vsel %vm518_vm4, %v1509_v63, %v1510_v12  ;;  %v752_v29 = vsel %vm750_vm6, %v1524_v24, %v1525_v23 }
  0xb1   : > { %578 = vmatpush.msra.mxu2 %v520_v2  ;;  %v1434_v2 = vld [vmem:[%s1926_s1 + $0x70] sm:$0xff] }
  0xb2   : > { %1393 = vmatmul.msk.f32.vlgmr.msra.gmra.mxu1 %vm219_vm1, %v1390_v1  ;;  %1396 = vmatmul.msk.f32.vlgmr.msra.gmra.mxu2 %vm219_vm1, %v1390_v1  ;;  %v629_v3 = vpop.permute.xlu0 %628 }
  0xb3   : > { %1409 = vmatpush.msk.msrb.mxu2 %vm226_vm0, %v640_v0  ;;  %v638_v4 = vsel %vm634_vm5, %v627_v41, %v629_v3  ;;  %v639_v5 = vsel %vm634_vm5, %v629_v3, %v631_v51 }
  0xb4   : > { %1403 = vmatpush.msk.msrb.mxu0 %vm226_vm0, %v638_v4  ;;  %1406 = vmatpush.msk.msrb.mxu1 %vm226_vm0, %v639_v5 }
  0xb5   : > { %v1513_v7 = vpop.permute.xlu1 %1512  ;;  %v1528_v20 = vpop.permute.xlu2 %1527 }
  0xb6   : > { %v1515_v8 = vunpack.i.h.bf16 %v1513_v7  ;;  %v1514_v9 = vunpack.i.l.bf16 %v1513_v7  ;;  %v1529_v30 = vunpack.i.l.bf16 %v1528_v20  ;;  %v1530_v33 = vunpack.i.h.bf16 %v1528_v20  ;;  %v1435_v7 = vld [vmem:[%s1926_s1 + $0x78] sm:$0x1f] }
  0xb8   : > { %1389 = vmatmul.msk.f32.gmra.mxu0 %vm219_vm1, %v1380_v56  ;;  %v635_v11 = vsel %vm634_vm5, %v1514_v9, %v1515_v8  ;;  %v753_v35 = vsel %vm750_vm6, %v1525_v23, %v1529_v30  ;;  %v751_v39 = vsel %vm750_vm6, %v1530_v33, %v1524_v24  ;;  %v1446_v23 = vld [vmem:[%s1926_s1 + $0x88] sm:$0x1f] }
  0xb9   : > { %671 = vmatpush.msrb.mxu0 %v635_v11 }
  0xba   : > { %1394 = vmatmul.msk.f32.gmra.mxu1 %vm219_vm1, %v1391_v10  ;;  %1397 = vmatmul.msk.f32.gmra.mxu2 %vm219_vm1, %v1391_v10  ;;  %v517_v13 = vpop.permute.xlu0 %516 }
  0xbb   : > { %v524_v14 = vsel %vm518_vm4, %v515_v59, %v517_v13 }
  0xbc   : > { %1398 = vmatpush.msk.msra.mxu3 %vm226_vm0, %v524_v14 }
  0xbd   : > { %v1518_v15 = vpop.permute.xlu1 %1517  ;;  %v1533_v31 = vpop.permute.xlu2 %1532 }
  0xbe   : > { %v1520_v17 = vunpack.i.h.bf16 %v1518_v15  ;;  %v1519_v18 = vunpack.i.l.bf16 %v1518_v15  ;;  %601 = vmatpush.msra.mxu3 %v521_v19  ;;  %v1535_v40 = vunpack.i.h.bf16 %v1533_v31  ;;  %v1534_v41 = vunpack.i.l.bf16 %v1533_v31  ;;  %v1445_v15 = vld [vmem:[%s1926_s1 + $0x80] sm:$0xff] }
  0xbf   : > { %1399 = vmatmul.msk.f32.vlgmr.msra.gmra.mxu3 %vm219_vm1, %v1390_v1 }
  0xc0   : > { %1404 = vmatmul.msk.f32.vlgmr.msrb.gmra.mxu0 %vm219_vm1, %v1401_v16  ;;  %v636_v21 = vsel %vm634_vm5, %v1515_v8, %v1519_v18  ;;  %v637_v22 = vsel %vm634_vm5, %v1519_v18, %v1520_v17  ;;  %v867_v47 = vsel %vm866_vm7, %v1534_v41, %v1535_v40  ;;  %v331_v41 = vpop.f32.mrf.mxu3 }
  0xc1   : > { %694 = vmatpush.msrb.mxu1 %v636_v21  ;;  %717 = vmatpush.msrb.mxu2 %v637_v22 }
  0xc2   : > { %1407 = vmatmul.msk.f32.vlgmr.msrb.gmra.mxu1 %vm219_vm1, %v1401_v16  ;;  %1410 = vmatmul.msk.f32.vlgmr.msrb.gmra.mxu2 %vm219_vm1, %v1401_v16  ;;  %v745_v25 = vpop.permute.xlu0 %744 }
  0xc5   : > { %v747_v26 = vpop.permute.xlu1 %746  ;;  %v1538_v42 = vpop.permute.xlu2 %1537 }
  0xc6   : > { %v755_v28 = vsel %vm750_vm6, %v745_v25, %v747_v26  ;;  %v1539_v48 = vunpack.i.l.bf16 %v1538_v42  ;;  %v1540_v50 = vunpack.i.h.bf16 %v1538_v42 }
  0xc7   : > { %1417 = vmatpush.msk.msra.mxu0 %vm226_vm0, %v755_v28  ;;  %1400 = vmatmul.msk.f32.gmra.mxu3 %vm219_vm1, %v1391_v10 }
  0xc8   : > { %1405 = vmatmul.msk.f32.gmra.mxu0 %vm219_vm1, %v1402_v27  ;;  %v868_v53 = vsel %vm866_vm7, %v1535_v40, %v1539_v48  ;;  %v869_v57 = vsel %vm866_vm7, %v1539_v48, %v1540_v50 }
  0xc9   : > { %810 = vmatpush.msra.mxu0 %v752_v29 }
  0xca   : > { %1408 = vmatmul.msk.f32.gmra.mxu1 %vm219_vm1, %v1402_v27  ;;  %1411 = vmatmul.msk.f32.gmra.mxu2 %vm219_vm1, %v1402_v27  ;;  %v749_v32 = vpop.permute.xlu0 %748 }
  0xcb   : > { %v756_v34 = vsel %vm750_vm6, %v747_v26, %v749_v32 }
  0xcc   : > { %1420 = vmatpush.msk.msra.mxu1 %vm226_vm0, %v756_v34 }
  0xcd   : > { %v743_v36 = vpop.permute.xlu1 %742  ;;  %v1543_v54 = vpop.permute.xlu2 %1542 }
  0xce   : > { %v754_v38 = vsel %vm750_vm6, %v743_v36, %v745_v25  ;;  %833 = vmatpush.msra.mxu1 %v753_v35  ;;  %v1545_v59 = vunpack.i.h.bf16 %v1543_v54  ;;  %v1544_v60 = vunpack.i.l.bf16 %v1543_v54 }
  0xcf   : > { %1414 = vmatpush.msk.msrb.mxu3 %vm226_vm0, %v754_v38 }
  0xd0   : > { %1418 = vmatmul.msk.f32.vlgmr.msra.gmra.mxu0 %vm219_vm1, %v1412_v37  ;;  %v983_v0 = vsel %vm982_vm8, %v1544_v60, %v1545_v59 }
  0xd1   : > { %787 = vmatpush.msrb.mxu3 %v751_v39 }
  0xd2   : > { %1415 = vmatmul.msk.f32.vlgmr.msrb.gmra.mxu3 %vm219_vm1, %v1412_v37  ;;  %1421 = vmatmul.msk.f32.vlgmr.msra.gmra.mxu1 %vm219_vm1, %v1412_v37  ;;  %v859_v43 = vpop.permute.xlu0 %858 }
  0xd5   : > { %v861_v44 = vpop.permute.xlu1 %860  ;;  %v1091_v1 = vpop.permute.xlu2 %1090 }
  0xd6   : > { %v870_v46 = vsel %vm866_vm7, %v859_v43, %v861_v44 }
  0xd7   : > { %1425 = vmatpush.msk.msra.mxu2 %vm226_vm0, %v870_v46 }
  0xd8   : > { %1419 = vmatmul.msk.f32.gmra.mxu0 %vm219_vm1, %v1413_v45 }
  0xd9   : > { %903 = vmatpush.msra.mxu2 %v867_v47  ;;  %v334_v47 = vpop.f32.mrf.mxu3 }
  0xda   : > { %1416 = vmatmul.msk.f32.gmra.mxu3 %vm219_vm1, %v1413_v45  ;;  %1422 = vmatmul.msk.f32.gmra.mxu1 %vm219_vm1, %v1413_v45  ;;  %v863_v51 = vpop.permute.xlu0 %862 }
  0xdb   : > { %1426 = vmatmul.msk.f32.vlgmr.msra.gmra.mxu2 %vm219_vm1, %v1423_v49  ;;  %v871_v52 = vsel %vm866_vm7, %v861_v44, %v863_v51 }
  0xdc   : > { %1428 = vmatpush.msk.msra.mxu3 %vm226_vm0, %v871_v52 }
  0xdd   : > { %v865_v55 = vpop.permute.xlu1 %864  ;;  %v1095_v8 = vpop.permute.xlu2 %1094 }
  0xde   : > { %v872_v56 = vsel %vm866_vm7, %v863_v51, %v865_v55  ;;  %926 = vmatpush.msra.mxu3 %v868_v53 }
  0xdf   : > { %1431 = vmatpush.msk.msrb.mxu0 %vm226_vm0, %v872_v56 }
  0xe1   : > { %949 = vmatpush.msrb.mxu0 %v869_v57 }
  0xe2   : > { %1429 = vmatmul.msk.f32.vlgmr.msra.gmra.mxu3 %vm219_vm1, %v1423_v49  ;;  %1432 = vmatmul.msk.f32.vlgmr.msrb.gmra.mxu0 %vm219_vm1, %v1423_v49  ;;  %v975_v61 = vpop.permute.xlu0 %974 }
  0xe3   : > { %1427 = vmatmul.msk.f32.gmra.mxu2 %vm219_vm1, %v1424_v58 }
  0xe5   : > { %v977_v62 = vpop.permute.xlu1 %976  ;;  %v973_v17 = vpop.permute.xlu2 %972 }
  0xe6   : > { %v986_v63 = vsel %vm982_vm8, %v975_v61, %v977_v62 }
  0xe7   : > { %1436 = vmatpush.msk.msrb.mxu1 %vm226_vm0, %v986_v63 }
  0xe9   : > { %1019 = vmatpush.msrb.mxu1 %v983_v0 }
  0xea   : > { %1430 = vmatmul.msk.f32.gmra.mxu3 %vm219_vm1, %v1424_v58  ;;  %1433 = vmatmul.msk.f32.gmra.mxu0 %vm219_vm1, %v1424_v58  ;;  %v979_v3 = vpop.permute.xlu0 %978 }
  0xeb   : > { %1437 = vmatmul.msk.f32.vlgmr.msrb.gmra.mxu1 %vm219_vm1, %v1434_v2  ;;  %v987_v4 = vsel %vm982_vm8, %v977_v62, %v979_v3 }
  0xec   : > { %1439 = vmatpush.msk.msrb.mxu2 %vm226_vm0, %v987_v4 }
  0xed   : > { %v971_v5 = vpop.permute.xlu1 %970 }
  0xee   : > { %v984_v6 = vsel %vm982_vm8, %v1545_v59, %v971_v5  ;;  %v985_v21 = vsel %vm982_vm8, %v971_v5, %v973_v17  ;;  %v1195_v17 = vlaneseq }
  0xef   : > { %1042 = vmatpush.msrb.mxu2 %v984_v6 }
  0xf0   : > { %1440 = vmatmul.msk.f32.vlgmr.msrb.gmra.mxu2 %vm219_vm1, %v1434_v2 }
  0xf2   : > { %v1093_v9 = vpop.permute.xlu0 %1092 }
  0xf3   : > { %1438 = vmatmul.msk.f32.gmra.mxu1 %vm219_vm1, %v1435_v7  ;;  %v1102_v10 = vsel %vm1098_vm9, %v1091_v1, %v1093_v9  ;;  %v1103_v11 = vsel %vm1098_vm9, %v1093_v9, %v1095_v8 }
  0xf4   : > { %1447 = vmatpush.msk.msra.mxu0 %vm226_vm0, %v1102_v10  ;;  %1450 = vmatpush.msk.msra.mxu1 %vm226_vm0, %v1103_v11 }
  0xf5   : > { %v1548_v12 = vpop.permute.xlu1 %1547 }
  0xf6   : > { %v1550_v13 = vunpack.i.h.bf16 %v1548_v12  ;;  %v1549_v14 = vunpack.i.l.bf16 %v1548_v12 }
  0xf8   : > { %1441 = vmatmul.msk.f32.gmra.mxu2 %vm219_vm1, %v1435_v7  ;;  %v1099_v16 = vsel %vm1098_vm9, %v1549_v14, %v1550_v13 }
  0xf9   : > { %1135 = vmatpush.msra.mxu0 %v1099_v16 }
  0xfa   : > { %1448 = vmatmul.msk.f32.vlgmr.msra.gmra.mxu0 %vm219_vm1, %v1445_v15  ;;  %v981_v18 = vpop.permute.xlu0 %980 }
  0xfb   : > { %v988_v19 = vsel %vm982_vm8, %v979_v3, %v981_v18 }
  0xfc   : > { %1442 = vmatpush.msk.msrb.mxu3 %vm226_vm0, %v988_v19 }
  0xfd   : > { %v1087_v20 = vpop.permute.xlu1 %1086 }
  0xfe   : > { %v1100_v22 = vsel %vm1098_vm9, %v1550_v13, %v1087_v20  ;;  %1065 = vmatpush.msrb.mxu3 %v985_v21 }
  0xff   : > { %1158 = vmatpush.msra.mxu1 %v1100_v22  ;;  %1443 = vmatmul.msk.f32.vlgmr.msrb.gmra.mxu3 %vm219_vm1, %v1434_v2 }
 0x100   : > { %1451 = vmatmul.msk.f32.vlgmr.msra.gmra.mxu1 %vm219_vm1, %v1445_v15 }
 0x102   : > { %1449 = vmatmul.msk.f32.gmra.mxu0 %vm219_vm1, %v1446_v23  ;;  %v1097_v24 = vpop.permute.xlu0 %1096 }
 0x103   : > { %v1104_v25 = vsel %vm1098_vm9, %v1095_v8, %v1097_v24  ;;  %v1196_v24 = vshrl.u32 %v1195_v17, 7 }
 0x104   : > { %1453 = vmatpush.msk.msra.mxu2 %vm226_vm0, %v1104_v25 }
 0x105   : > { %v1089_v26 = vpop.permute.xlu1 %1088 }
 0x106   : > { %v1101_v27 = vsel %vm1098_vm9, %v1087_v20, %v1089_v26 }
 0x107   : > { %1181 = vmatpush.msra.mxu2 %v1101_v27  ;;  %1444 = vmatmul.msk.f32.gmra.mxu3 %vm219_vm1, %v1435_v7 }
 0x108   : > { %1452 = vmatmul.msk.f32.gmra.mxu1 %vm219_vm1, %v1446_v23  ;;  %1454 = vmatmul.msk.f32.vlgmr.msra.gmra.mxu2 %vm219_vm1, %v1445_v15 }
 0x10d   : > { %v250_v28 = vpop.f32.mrf.mxu0 }
 0x10e   : > { %v332_v12 = vadd.f32 %v331_v41, %v250_v28 }
 0x10f   : > { %v273_v29 = vpop.f32.mrf.mxu1 }
 0x110   : > { %1455 = vmatmul.msk.f32.gmra.mxu2 %vm219_vm1, %v1446_v23 }
 0x115   : > { %v253_v30 = vpop.f32.mrf.mxu0  ;;  %v296_v31 = vpop.f32.mrf.mxu2 }
 0x116   : > { %v335_v11 = vadd.f32 %v334_v47, %v253_v30 }
 0x117   : > { %v276_v32 = vpop.f32.mrf.mxu1 }
 0x11d   : > { %v354_v33 = vpop.f32.mrf.mxu0  ;;  %v299_v37 = vpop.f32.mrf.mxu2 }
 0x11e   : > { %v355_v34 = vadd.f32 %v354_v33, %v273_v29 }
 0x11f   : > { %v377_v35 = vpop.f32.mrf.mxu1 }
 0x120   : > { %v378_v36 = vadd.f32 %v377_v35, %v296_v31  ;;  %v1197_v35 = vadd.s32 8, %v1196_v24 }
 0x122   : > { %v464_v52 = vpop.f32.mrf.mxu3  ;;  %vm1199_vm10 = vcmp.eq.s32.totalorder %v1197_v35, 12 }
 0x123   : > { %v494_v27 = vadd.f32 %v464_v52, %v355_v34 }
 0x125   : > { %v357_v38 = vpop.f32.mrf.mxu0  ;;  %v441_v43 = vpop.f32.mrf.mxu2 }
 0x126   : > { %v358_v39 = vadd.f32 %v357_v38, %v276_v32  ;;  %v493_v15 = vadd.f32 %v441_v43, %v332_v12 }
 0x127   : > { %v380_v40 = vpop.f32.mrf.mxu1 }
 0x128   : > { %v381_v42 = vadd.f32 %v380_v40, %v299_v37 }
 0x12a   : > { %v467_v56 = vpop.f32.mrf.mxu3 }
 0x12b   : > { %v497_v25 = vadd.f32 %v467_v56, %v358_v39 }
 0x12d   : > { %v487_v44 = vpop.f32.mrf.mxu0  ;;  %v444_v48 = vpop.f32.mrf.mxu2 }
 0x12e   : > { %v1876_v45 = vadd.f32 %v487_v44, %v378_v36  ;;  %v496_v13 = vadd.f32 %v444_v48, %v335_v11 }
 0x12f   : > { %v557_v46 = vpop.f32.mrf.mxu1 }
 0x130   : > { %v609_v19 = vadd.f32 %v557_v46, %v493_v15 }
 0x135   : > { %v490_v49 = vpop.f32.mrf.mxu0  ;;  %v580_v53 = vpop.f32.mrf.mxu2 }
 0x136   : > { %v1878_v50 = vadd.f32 %v490_v49, %v381_v42  ;;  %v610_v30 = vadd.f32 %v580_v53, %v494_v27 }
 0x137   : > { %v560_v51 = vpop.f32.mrf.mxu1 }
 0x138   : > { %v612_v18 = vadd.f32 %v560_v51, %v496_v13 }
 0x13d   : > { %v673_v54 = vpop.f32.mrf.mxu0  ;;  %v583_v57 = vpop.f32.mrf.mxu2 }
 0x13e   : > { %v725_v23 = vadd.f32 %v673_v54, %v609_v19  ;;  %v613_v31 = vadd.f32 %v583_v57, %v497_v25 }
 0x13f   : > { %v696_v55 = vpop.f32.mrf.mxu1 }
 0x140   : > { %v726_v40 = vadd.f32 %v696_v55, %v610_v30  ;;  %v1212_v55 = vld [vmem:[%s1927_s2] sm:$0x7] }
 0x142   : > { %v1880_v59 = vpop.f32.mrf.mxu3 }
 0x145   : > { %v676_v58 = vpop.f32.mrf.mxu0  ;;  %v1882_v61 = vpop.f32.mrf.mxu2 }
 0x146   : > { %v728_v22 = vadd.f32 %v676_v58, %v612_v18 }
 0x147   : > { %v699_v60 = vpop.f32.mrf.mxu1 }
 0x148   : > { %v729_v36 = vadd.f32 %v699_v60, %v613_v31 }
 0x14a   : > { %v1884_v63 = vpop.f32.mrf.mxu3 }
 0x14d   : > { %v812_v62 = vpop.f32.mrf.mxu0  ;;  %v1888_v1 = vpop.f32.mrf.mxu2 }
 0x14e   : > { %v842_v46 = vadd.f32 %v812_v62, %v726_v40 }
 0x14f   : > { %v1886_v0 = vpop.f32.mrf.mxu1 }
 0x155   : > { %v815_v2 = vpop.f32.mrf.mxu0  ;;  %v789_v3 = vpop.f32.mrf.mxu3 }
 0x156   : > { %v841_v29 = vadd.f32 %v789_v3, %v725_v23  ;;  %v845_v43 = vadd.f32 %v815_v2, %v729_v36  ;;  %v614_v2 = vadd.f32 %v1884_v63, %v1878_v50  ;;  %v611_v3 = vadd.f32 %v1880_v59, %v1876_v45 }
 0x157   : > { %v1890_v4 = vpop.f32.mrf.mxu1 }
 0x158   : > { %v727_v11 = vadd.f32 %v1882_v61, %v611_v3 }
 0x15a   : > { %v843_v13 = vadd.f32 %v1886_v0, %v727_v11 }
 0x15d   : > { %v792_v7 = vpop.f32.mrf.mxu3 }
 0x15e   : > { %v905_v5 = vpop.f32.mrf.mxu2  ;;  %v844_v26 = vadd.f32 %v792_v7, %v728_v22 }
 0x15f   : > { %v1892_v6 = vpop.f32.mrf.mxu0  ;;  %v957_v28 = vadd.f32 %v905_v5, %v841_v29 }
 0x160   : > { %v959_v59 = vadd.f32 %v1892_v6, %v843_v13 }
 0x165   : > { %v928_v14 = vpop.f32.mrf.mxu3 }
 0x166   : > { %v908_v9 = vpop.f32.mrf.mxu2  ;;  %v958_v49 = vadd.f32 %v928_v14, %v842_v46 }
 0x167   : > { %v1894_v10 = vpop.f32.mrf.mxu0  ;;  %v960_v32 = vadd.f32 %v908_v9, %v844_v26  ;;  %v730_v9 = vadd.f32 %v1888_v1, %v614_v2 }
 0x168   : > { %v1021_v8 = vpop.f32.mrf.mxu1 }
 0x169   : > { %v1073_v41 = vadd.f32 %v1021_v8, %v957_v28  ;;  %v846_v12 = vadd.f32 %v1890_v4, %v730_v9 }
 0x16b   : > { %v962_v45 = vadd.f32 %v1894_v10, %v846_v12 }
 0x16d   : > { %v931_v37 = vpop.f32.mrf.mxu3 }
 0x16e   : > { %v961_v34 = vadd.f32 %v931_v37, %v845_v43 }
 0x170   : > { %v1024_v16 = vpop.f32.mrf.mxu1 }
 0x171   : > { %v1076_v38 = vadd.f32 %v1024_v16, %v960_v32 }
 0x173   : > { %v1044_v20 = vpop.f32.mrf.mxu2 }
 0x174   : > { %v1074_v53 = vadd.f32 %v1044_v20, %v958_v49 }
 0x177   : > { %v1137_v21 = vpop.f32.mrf.mxu0 }
 0x178   : > { %v1189_v47 = vadd.f32 %v1137_v21, %v1073_v41 }
 0x17a   : > { %v1200_v54 = vmul.f32 %v1189_v47, %v1189_v47 }
 0x17b   : > { %v1047_v39 = vpop.f32.mrf.mxu2 }
 0x17c   : > { %v1077_v51 = vadd.f32 %v1047_v39, %v961_v34 }
 0x17d   : > { %v1160_v33 = vpop.f32.mrf.mxu1 }
 0x17e   : > { %v1190_v60 = vadd.f32 %v1160_v33, %v1074_v53 }
 0x17f   : > { %v1140_v42 = vpop.f32.mrf.mxu0 }
 0x180   : > { %v1192_v44 = vadd.f32 %v1140_v42, %v1076_v38  ;;  %v1201_v7 = vmul.f32 %v1190_v60, %v1190_v60 }
 0x182   : > { %v1203_v48 = vmul.f32 %v1192_v44, %v1192_v44  ;;  %v1067_v57 = vpop.f32.mrf.mxu3 }
 0x183   : > { %v1075_v14 = vadd.f32 %v1067_v57, %v959_v59 }
 0x184   : > { %v1209_v52 = vsel %vm1199_vm10, 1.0, %v1203_v48 }
 0x185   : > { %v1163_v56 = vpop.f32.mrf.mxu1  ;;  %1456 = vmatpush.msk.msra.mxu3 %vm1217_vm11, %v1209_v52 }
 0x186   : > { %v1193_v58 = vadd.f32 %v1163_v56, %v1077_v51 }
 0x187   : > { %1242 = vmatpush.msra.mxu3 %v1200_v54 }
 0x188   : > { %v1204_v62 = vmul.f32 %v1193_v58, %v1193_v58  ;;  %1457 = vmatmul.msk.f32.vlgmr.msra.gmra.mxu3 %vm1213_vm12, %v1212_v55 }
 0x18a   : > { %v1210_v5 = vsel %vm1199_vm10, 1.0, %v1204_v62  ;;  %v1070_v50 = vpop.f32.mrf.mxu3 }
 0x18b   : > { %1458 = vmatpush.msk.msrb.mxu3 %vm1217_vm11, %v1210_v5  ;;  %v1183_v8 = vpop.f32.mrf.mxu2  ;;  %v1078_v63 = vadd.f32 %v1070_v50, %v962_v45 }
 0x18c   : > { %v1191_v1 = vadd.f32 %v1183_v8, %v1075_v14 }
 0x18d   : > { %1262 = vmatpush.msrb.mxu3 %v1201_v7 }
 0x18e   : > { %v1202_v18 = vmul.f32 %v1191_v1, %v1191_v1 }
 0x190   : > { %1459 = vmatmul.msk.f32.vlgmr.msrb.gmra.mxu3 %vm1213_vm12, %v1212_v55 }
 0x193   : > { %v1186_v15 = vpop.f32.mrf.mxu2 }
 0x194   : > { %v1194_v16 = vadd.f32 %v1186_v15, %v1078_v63 }
 0x196   : > { %v1205_v17 = vmul.f32 %v1194_v16, %v1194_v16 }
 0x198   : > { %v1211_v61 = vsel %vm1199_vm10, 1.0, %v1205_v17 }
 0x199   : > { %1460 = vmatpush.msk.msrb.mxu0 %vm1217_vm11, %v1211_v61 }
 0x19b   : > { %1282 = vmatpush.msrb.mxu0 %v1202_v18 }
 0x19c   : > { %1461 = vmatmul.msk.f32.vlgmr.msrb.gmra.mxu0 %vm1213_vm12, %v1212_v55 }
 0x20b   : > { %v1244_v0 = vpop.f32.mrf.mxu3 }
 0x213   : > { %v1264_v4 = vpop.f32.mrf.mxu3 }
 0x214   : > { %v1289_v6 = vrot.slane %v1264_v4, 4 }
 0x216   : > { %v1291_v10 = vsel %vm1290_vm13, %v1244_v0, %v1289_v6 }
 0x217   : > { %1293 = vst [vmem:[%s170_s19] sm:$0x77] %v1291_v10 }
 0x219   : > { %v1284_v19 = vpop.f32.mrf.mxu0 }
 0x21a   : > { %1294 = vst [vmem:[%s170_s19 + $0x8] sm:$0x7] %v1284_v19 }
 0x21b PF: > { %s13_s12 = sadd.s32 1, %s1557_s12  }
 0x21c   : > { %p10_p5 = scmp.ge.s32.totalorder %s13_s12, 4  }
 0x21e   :  { %12 = sbr.rel (!%p10_p5) target bundleno = 1 (0x1), region = 70 }

</bundles_post_ra>
